<compile_context>
chip_gen: v7x
topology: tpu7x:2x2x1
jax: 0.10.0
libtpu: 0.0.40
codegen_flags: <defaults>
</compile_context>

<pallas_src>
import jax
import jax.numpy as jnp
import numpy as np
from jax.experimental import pallas as pl
from jax.experimental.pallas import tpu as pltpu

# ----------------------------- config (small, synthetic) -----------------------------
S = 2                    # batch ('s')
T = 8                    # query points per sample ('t')
NUM_OUTPUT = 2           # 'o'
NUM_BASIS = 16           # 'p' (numBasisFunctions)

BRANCH_IN = 8
BRANCH_HIDDEN = 32
BRANCH_NHID = 2
BRANCH_OUT = 32          # == mainBranchInChannels

MAIN_IN = BRANCH_OUT
MAIN_HIDDEN = 32
MAIN_NHID = 2
MAIN_OUT = NUM_OUTPUT * NUM_BASIS
MAIN_ACT_LAST = False    # mainBranchActivateLastLayer

TRUNK_IN = 2
TRUNK_HIDDEN = 32
TRUNK_NHID = 2
TRUNK_OUT = NUM_OUTPUT * NUM_BASIS
TRUNK_ACT_LAST = True    # trunkActivateLastLayer

ENABLE_BIAS = True       # enableFinalBias

# packed slab widths (zero-padded square layers so a single (L, D, D) slab per MLP works)
D_BRANCH = 3 * max(BRANCH_IN, BRANCH_HIDDEN, BRANCH_OUT)   # fused block-diag width = 96
D_MAIN = max(MAIN_IN, MAIN_HIDDEN, MAIN_OUT)               # 32
D_TRUNK = max(TRUNK_IN, TRUNK_HIDDEN, TRUNK_OUT)           # 32
O_PAD = 128              # lane-dense output slab width (unmasked vector stores)

assert D_MAIN == BRANCH_OUT, "kernel assumes no re-padding between branch product and main"


# ----------------------------- parameter construction -----------------------------
def mlp_layer_dims(d_in, d_out, n_hidden, hidden):
    return [d_in] + [hidden] * n_hidden + [d_out]


def init_mlp_params(key, dims):
    """Deterministic synthetic init. Returns flat list [W0, b0, W1, b1, ...]."""
    params = []
    for d_in, d_out in zip(dims[:-1], dims[1:]):
        key, kw, kb = jax.random.split(key, 3)
        w = jax.random.normal(kw, (d_in, d_out), jnp.float32) / np.sqrt(d_in)
        b = 0.01 * jax.random.normal(kb, (1, d_out), jnp.float32)
        params.extend([w, b])
    return key, params


def mlp_apply(x, params, activate_last):
    """Plain-JAX FFN (reference only)."""
    n_layers = len(params) // 2
    for i in range(n_layers):
        w, b = params[2 * i], params[2 * i + 1]
        x = jnp.dot(x, w, preferred_element_type=jnp.float32) + b
        if i < n_layers - 1 or activate_last:
            x = jnp.tanh(x)
    return x


# ----------------------------- one-time parameter packing ----------------------------
def _pad_to(a, shape):
    out = jnp.zeros(shape, jnp.float32)
    return out.at[tuple(slice(0, s) for s in a.shape)].set(a)


def pack_mlp_slabs(params, d_max):
    """[W0,b0,W1,b1,...] -> ((L, d_max, d_max) weight slab, (L, 1, d_max) bias slab)."""
    ws, bs = params[0::2], params[1::2]
    w_slab = jnp.stack([_pad_to(w, (d_max, d_max)) for w in ws])
    b_slab = jnp.stack([_pad_to(b, (1, d_max)) for b in bs])
    return w_slab, b_slab


def fuse_branch_params(branch_params_list):
    """Fuse 3 identical-architecture branch MLPs into one block-diagonal MLP."""
    n_layers = len(branch_params_list[0]) // 2
    fused = []
    for l in range(n_layers):
        ws = [bp[2 * l] for bp in branch_params_list]
        bs = [bp[2 * l + 1] for bp in branch_params_list]
        din, dout = ws[0].shape
        w = jnp.zeros((3 * din, 3 * dout), jnp.float32)
        for i in range(3):
            w = w.at[i * din:(i + 1) * din, i * dout:(i + 1) * dout].set(ws[i])
        b = jnp.concatenate(bs, axis=-1)
        fused.extend([w, b])
    return fused


def pack_params(branch_params_list, main_params, trunk_params, bias):
    """Run ONCE per parameter set (params-only work hoisted out of the per-call path)."""
    fused_branch = fuse_branch_params(branch_params_list)
    bw, bb = pack_mlp_slabs(fused_branch, D_BRANCH)    # (3, 96, 96), (3, 1, 96)
    mw, mb = pack_mlp_slabs(main_params, D_MAIN)       # (3, 32, 32), (3, 1, 32)
    tw, tb = pack_mlp_slabs(trunk_params, D_TRUNK)     # (3, 32, 32), (3, 1, 32)

    # block-one-hot group-sum matrix: gmat[o*P + p, o] = 1, zero-padded to O_PAD lanes
    gmat_np = np.kron(np.eye(NUM_OUTPUT, dtype=np.float32),
                      np.ones((NUM_BASIS, 1), np.float32))            # (O*P, O)
    gmat = jnp.asarray(np.pad(gmat_np, ((0, 0), (0, O_PAD - NUM_OUTPUT))))  # (O*P, O_PAD)

    # zero-padded final-bias row, applied with a single broadcast add in-kernel
    bias_row = jnp.zeros((1, O_PAD), jnp.float32)
    if bias is not None:
        bias_row = bias_row.at[0, :NUM_OUTPUT].set(bias.reshape(-1))

    return dict(bw=bw, bb=bb, mw=mw, mb=mb, tw=tw, tb=tb, gmat=gmat, bias_row=bias_row)


# ----------------------------- Pallas kernel -----------------------------
def edeeponet_kernel(x_ref, d_ref, bw_ref, bb_ref, mw_ref, mb_ref, tw_ref, tb_ref,
                     gmat_ref, bias_ref, out_ref):
    """Whole forward pass in one grid-less kernel invocation (all operands in VMEM)."""
    # --- fused input branches (block-diagonal): (S, D_BRANCH) -> (S, D_BRANCH) ---
    h = x_ref[...]
    n_b = bw_ref.shape[0]
    for i in range(n_b):
        h = jnp.dot(h, bw_ref[i], preferred_element_type=jnp.float32) + bb_ref[i]
        if i < n_b - 1:                       # input branches: no activation on last layer
            h = jnp.tanh(h)
    # elementwise product of the three branch outputs (D_MAIN == BRANCH_OUT, no re-pad)
    g = (h[:, 0:BRANCH_OUT]
         * h[:, BRANCH_OUT:2 * BRANCH_OUT]
         * h[:, 2 * BRANCH_OUT:3 * BRANCH_OUT])

    # --- main branch: (S, D_MAIN) -> (S, MAIN_OUT) ---
    n_m = mw_ref.shape[0]
    for i in range(n_m):
        g = jnp.dot(g, mw_ref[i], preferred_element_type=jnp.float32) + mb_ref[i]
        if i < n_m - 1 or MAIN_ACT_LAST:
            g = jnp.tanh(g)
    branch_out = g[:, :MAIN_OUT]              # (S, O*P)

    # --- trunk, pointwise over S*T query points (padded input, no K=2 matmul) ---
    t = d_ref[...]
    n_t = tw_ref.shape[0]
    for i in range(n_t):
        t = jnp.dot(t, tw_ref[i], preferred_element_type=jnp.float32) + tb_ref[i]
        if i < n_t - 1 or TRUNK_ACT_LAST:
            t = jnp.tanh(t)
    trunk_out = t[:, :TRUNK_OUT]              # (S*T, O*P)

    # --- innerProduct 'sop,stop->sot': broadcast-mul (VPU) + group-sum matmul (MXU) ---
    prod3 = trunk_out.reshape(S, T, TRUNK_OUT) * branch_out[:, None, :]
    prod2 = prod3.reshape(S * T, TRUNK_OUT)
    res = jnp.dot(prod2, gmat_ref[...], preferred_element_type=jnp.float32)  # (S*T, O_PAD)

    # --- final per-output bias: one broadcast add of the pre-padded bias row ---
    res = res + bias_ref[...]

    out_ref[...] = res                        # lane-dense (S*T, 128) unmasked store


# ----------------------------- jitted forward -----------------------------
@jax.jit
def edeeponet_forward(inp, domain, packed):
    """Per-call path: activation padding + pallas_call + output layout, all fused by jit."""
    # fused-branch input and zero-padded trunk input
    x2d = jnp.pad(inp.reshape(S, 3 * BRANCH_IN),
                  ((0, 0), (0, D_BRANCH - 3 * BRANCH_IN)))        # (S, 96)
    d2d = jnp.pad(domain.reshape(S * T, TRUNK_IN),
                  ((0, 0), (0, D_TRUNK - TRUNK_IN)))              # (S*T, 32)

    flat_inputs = [x2d, d2d,
                   packed["bw"], packed["bb"],
                   packed["mw"], packed["mb"],
                   packed["tw"], packed["tb"],
                   packed["gmat"], packed["bias_row"]]

    vmem = pl.BlockSpec(memory_space=pltpu.MemorySpace.VMEM)
    out2d = pl.pallas_call(
        edeeponet_kernel,
        in_specs=[vmem] * len(flat_inputs),
        out_specs=vmem,
        out_shape=jax.ShapeDtypeStruct((S * T, O_PAD), jnp.float32),
    )(*flat_inputs)

    # wrapper-side layout plumbing back to the PyTorch output layout (S, O, T)
    return out2d[:, :NUM_OUTPUT].reshape(S, T, NUM_OUTPUT).transpose(0, 2, 1)


# ----------------------------- plain-JAX reference -----------------------------
def edeeponet_reference(inp, domain, branch_params_list, main_params, trunk_params, bias):
    bouts = [mlp_apply(inp[:, i, :], branch_params_list[i], False) for i in range(3)]
    input_to_main = bouts[0] * bouts[1] * bouts[2]
    branch_out = mlp_apply(input_to_main, main_params, MAIN_ACT_LAST)
    trunk_out = mlp_apply(domain.reshape(S * T, TRUNK_IN), trunk_params, TRUNK_ACT_LAST)
    trunk_out = trunk_out.reshape(S, T, NUM_OUTPUT * NUM_BASIS)
    br = branch_out.reshape(S, NUM_OUTPUT, NUM_BASIS)
    tr = trunk_out.reshape(S, T, NUM_OUTPUT, NUM_BASIS)
    res = jnp.einsum('sop,stop->sot', br, tr)
    if bias is not None:
        res = res + bias[None, :, :]
    return res


# ----------------------------- main -----------------------------
if __name__ == "__main__":
    key = jax.random.PRNGKey(0)

    key, k_in, k_dom = jax.random.split(key, 3)
    inp = jax.random.normal(k_in, (S, 3, BRANCH_IN), jnp.float32)
    domain = jax.random.normal(k_dom, (S, T, TRUNK_IN), jnp.float32)

    branch_params_list = []
    for _ in range(3):
        key, bp = init_mlp_params(
            key, mlp_layer_dims(BRANCH_IN, BRANCH_OUT, BRANCH_NHID, BRANCH_HIDDEN))
        branch_params_list.append(bp)
    key, main_params = init_mlp_params(
        key, mlp_layer_dims(MAIN_IN, MAIN_OUT, MAIN_NHID, MAIN_HIDDEN))
    key, trunk_params = init_mlp_params(
        key, mlp_layer_dims(TRUNK_IN, TRUNK_OUT, TRUNK_NHID, TRUNK_HIDDEN))

    # PyTorch initializes the final bias to zeros.
    bias = jnp.zeros((NUM_OUTPUT, 1), jnp.float32) if ENABLE_BIAS else None

    # one-time packing (params-only); per-call forward uses the cached slabs
    packed = jax.tree.map(jax.block_until_ready,
                          pack_params(branch_params_list, main_params, trunk_params, bias))

    out = edeeponet_forward(inp, domain, packed)
    out = jax.block_until_ready(out)

    ref = edeeponet_reference(inp, domain, branch_params_list, main_params, trunk_params, bias)
    assert out.shape == (S, NUM_OUTPUT, T)
    np.testing.assert_allclose(np.asarray(out), np.asarray(ref), atol=1e-4, rtol=1e-4)

    print("KERNEL_OK")
</pallas_src>

<mosaic_0001>
module attributes {stable_mosaic.version = 11 : i64} {
  func.func @edeeponet_kernel(%arg0: memref<2x96xf32, #tpu.memory_space<vmem>>, %arg1: memref<16x32xf32, #tpu.memory_space<vmem>>, %arg2: memref<3x96x96xf32, #tpu.memory_space<vmem>>, %arg3: memref<3x1x96xf32, #tpu.memory_space<vmem>>, %arg4: memref<3x32x32xf32, #tpu.memory_space<vmem>>, %arg5: memref<3x1x32xf32, #tpu.memory_space<vmem>>, %arg6: memref<3x32x32xf32, #tpu.memory_space<vmem>>, %arg7: memref<3x1x32xf32, #tpu.memory_space<vmem>>, %arg8: memref<32x128xf32, #tpu.memory_space<vmem>>, %arg9: memref<1x128xf32, #tpu.memory_space<vmem>>, %arg10: memref<16x128xf32, #tpu.memory_space<vmem>>) attributes {dimension_semantics = [], scalar_prefetch = 0 : i64, scratch_operands = 0 : i64, tpu.core_type = #tpu.core_type<tc>} {
    %c0 = arith.constant 0 : index
    %c0_0 = arith.constant 0 : index
    %0 = vector.load %arg0[%c0, %c0_0] : memref<2x96xf32, #tpu.memory_space<vmem>>, vector<2x96xf32>
    %c0_1 = arith.constant 0 : index
    %c0_2 = arith.constant 0 : index
    %c0_3 = arith.constant 0 : index
    %1 = vector.load %arg2[%c0_1, %c0_2, %c0_3] : memref<3x96x96xf32, #tpu.memory_space<vmem>>, vector<1x96x96xf32>
    %2 = vector.shape_cast %1 : vector<1x96x96xf32> to vector<96x96xf32>
    %cst = arith.constant dense<0.000000e+00> : vector<2x96xf32>
    %3 = tpu.matmul %0, %2, %cst {dimension_numbers = #tpu.dot_dimension_numbers<[1], [0], [0], [1], [0, 0, 1, 1], [], []>} : vector<2x96xf32>, vector<96x96xf32>, vector<2x96xf32> -> vector<2x96xf32>
    %c0_4 = arith.constant 0 : index
    %c0_5 = arith.constant 0 : index
    %c0_6 = arith.constant 0 : index
    %4 = vector.load %arg3[%c0_4, %c0_5, %c0_6] : memref<3x1x96xf32, #tpu.memory_space<vmem>>, vector<1x1x96xf32>
    %5 = vector.shape_cast %4 : vector<1x1x96xf32> to vector<1x96xf32>
    %6 = vector.broadcast %5 : vector<1x96xf32> to vector<2x96xf32>
    %7 = arith.addf %3, %6 : vector<2x96xf32>
    %8 = math.tanh %7 : vector<2x96xf32>
    %c1 = arith.constant 1 : index
    %c0_7 = arith.constant 0 : index
    %c0_8 = arith.constant 0 : index
    %9 = vector.load %arg2[%c1, %c0_7, %c0_8] : memref<3x96x96xf32, #tpu.memory_space<vmem>>, vector<1x96x96xf32>
    %10 = vector.shape_cast %9 : vector<1x96x96xf32> to vector<96x96xf32>
    %cst_9 = arith.constant dense<0.000000e+00> : vector<2x96xf32>
    %11 = tpu.matmul %8, %10, %cst_9 {dimension_numbers = #tpu.dot_dimension_numbers<[1], [0], [0], [1], [0, 0, 1, 1], [], []>} : vector<2x96xf32>, vector<96x96xf32>, vector<2x96xf32> -> vector<2x96xf32>
    %c1_10 = arith.constant 1 : index
    %c0_11 = arith.constant 0 : index
    %c0_12 = arith.constant 0 : index
    %12 = vector.load %arg3[%c1_10, %c0_11, %c0_12] : memref<3x1x96xf32, #tpu.memory_space<vmem>>, vector<1x1x96xf32>
    %13 = vector.shape_cast %12 : vector<1x1x96xf32> to vector<1x96xf32>
    %14 = vector.broadcast %13 : vector<1x96xf32> to vector<2x96xf32>
    %15 = arith.addf %11, %14 : vector<2x96xf32>
    %16 = math.tanh %15 : vector<2x96xf32>
    %c2 = arith.constant 2 : index
    %c0_13 = arith.constant 0 : index
    %c0_14 = arith.constant 0 : index
    %17 = vector.load %arg2[%c2, %c0_13, %c0_14] : memref<3x96x96xf32, #tpu.memory_space<vmem>>, vector<1x96x96xf32>
    %18 = vector.shape_cast %17 : vector<1x96x96xf32> to vector<96x96xf32>
    %cst_15 = arith.constant dense<0.000000e+00> : vector<2x96xf32>
    %19 = tpu.matmul %16, %18, %cst_15 {dimension_numbers = #tpu.dot_dimension_numbers<[1], [0], [0], [1], [0, 0, 1, 1], [], []>} : vector<2x96xf32>, vector<96x96xf32>, vector<2x96xf32> -> vector<2x96xf32>
    %c2_16 = arith.constant 2 : index
    %c0_17 = arith.constant 0 : index
    %c0_18 = arith.constant 0 : index
    %20 = vector.load %arg3[%c2_16, %c0_17, %c0_18] : memref<3x1x96xf32, #tpu.memory_space<vmem>>, vector<1x1x96xf32>
    %21 = vector.shape_cast %20 : vector<1x1x96xf32> to vector<1x96xf32>
    %22 = vector.broadcast %21 : vector<1x96xf32> to vector<2x96xf32>
    %23 = arith.addf %19, %22 : vector<2x96xf32>
    %24 = vector.extract_strided_slice %23 {offsets = [0, 0], sizes = [2, 32], strides = [1, 1]} : vector<2x96xf32> to vector<2x32xf32>
    %25 = vector.extract_strided_slice %23 {offsets = [0, 32], sizes = [2, 32], strides = [1, 1]} : vector<2x96xf32> to vector<2x32xf32>
    %26 = arith.mulf %24, %25 : vector<2x32xf32>
    %27 = vector.extract_strided_slice %23 {offsets = [0, 64], sizes = [2, 32], strides = [1, 1]} : vector<2x96xf32> to vector<2x32xf32>
    %28 = arith.mulf %26, %27 : vector<2x32xf32>
    %c0_19 = arith.constant 0 : index
    %c0_20 = arith.constant 0 : index
    %c0_21 = arith.constant 0 : index
    %29 = vector.load %arg4[%c0_19, %c0_20, %c0_21] : memref<3x32x32xf32, #tpu.memory_space<vmem>>, vector<1x32x32xf32>
    %30 = vector.shape_cast %29 : vector<1x32x32xf32> to vector<32x32xf32>
    %cst_22 = arith.constant dense<0.000000e+00> : vector<2x32xf32>
    %31 = tpu.matmul %28, %30, %cst_22 {dimension_numbers = #tpu.dot_dimension_numbers<[1], [0], [0], [1], [0, 0, 1, 1], [], []>} : vector<2x32xf32>, vector<32x32xf32>, vector<2x32xf32> -> vector<2x32xf32>
    %c0_23 = arith.constant 0 : index
    %c0_24 = arith.constant 0 : index
    %c0_25 = arith.constant 0 : index
    %32 = vector.load %arg5[%c0_23, %c0_24, %c0_25] : memref<3x1x32xf32, #tpu.memory_space<vmem>>, vector<1x1x32xf32>
    %33 = vector.shape_cast %32 : vector<1x1x32xf32> to vector<1x32xf32>
    %34 = vector.broadcast %33 : vector<1x32xf32> to vector<2x32xf32>
    %35 = arith.addf %31, %34 : vector<2x32xf32>
    %36 = math.tanh %35 : vector<2x32xf32>
    %c1_26 = arith.constant 1 : index
    %c0_27 = arith.constant 0 : index
    %c0_28 = arith.constant 0 : index
    %37 = vector.load %arg4[%c1_26, %c0_27, %c0_28] : memref<3x32x32xf32, #tpu.memory_space<vmem>>, vector<1x32x32xf32>
    %38 = vector.shape_cast %37 : vector<1x32x32xf32> to vector<32x32xf32>
    %cst_29 = arith.constant dense<0.000000e+00> : vector<2x32xf32>
    %39 = tpu.matmul %36, %38, %cst_29 {dimension_numbers = #tpu.dot_dimension_numbers<[1], [0], [0], [1], [0, 0, 1, 1], [], []>} : vector<2x32xf32>, vector<32x32xf32>, vector<2x32xf32> -> vector<2x32xf32>
    %c1_30 = arith.constant 1 : index
    %c0_31 = arith.constant 0 : index
    %c0_32 = arith.constant 0 : index
    %40 = vector.load %arg5[%c1_30, %c0_31, %c0_32] : memref<3x1x32xf32, #tpu.memory_space<vmem>>, vector<1x1x32xf32>
    %41 = vector.shape_cast %40 : vector<1x1x32xf32> to vector<1x32xf32>
    %42 = vector.broadcast %41 : vector<1x32xf32> to vector<2x32xf32>
    %43 = arith.addf %39, %42 : vector<2x32xf32>
    %44 = math.tanh %43 : vector<2x32xf32>
    %c2_33 = arith.constant 2 : index
    %c0_34 = arith.constant 0 : index
    %c0_35 = arith.constant 0 : index
    %45 = vector.load %arg4[%c2_33, %c0_34, %c0_35] : memref<3x32x32xf32, #tpu.memory_space<vmem>>, vector<1x32x32xf32>
    %46 = vector.shape_cast %45 : vector<1x32x32xf32> to vector<32x32xf32>
    %cst_36 = arith.constant dense<0.000000e+00> : vector<2x32xf32>
    %47 = tpu.matmul %44, %46, %cst_36 {dimension_numbers = #tpu.dot_dimension_numbers<[1], [0], [0], [1], [0, 0, 1, 1], [], []>} : vector<2x32xf32>, vector<32x32xf32>, vector<2x32xf32> -> vector<2x32xf32>
    %c2_37 = arith.constant 2 : index
    %c0_38 = arith.constant 0 : index
    %c0_39 = arith.constant 0 : index
    %48 = vector.load %arg5[%c2_37, %c0_38, %c0_39] : memref<3x1x32xf32, #tpu.memory_space<vmem>>, vector<1x1x32xf32>
    %49 = vector.shape_cast %48 : vector<1x1x32xf32> to vector<1x32xf32>
    %50 = vector.broadcast %49 : vector<1x32xf32> to vector<2x32xf32>
    %51 = arith.addf %47, %50 : vector<2x32xf32>
    %c0_40 = arith.constant 0 : index
    %c0_41 = arith.constant 0 : index
    %52 = vector.load %arg1[%c0_40, %c0_41] : memref<16x32xf32, #tpu.memory_space<vmem>>, vector<16x32xf32>
    %c0_42 = arith.constant 0 : index
    %c0_43 = arith.constant 0 : index
    %c0_44 = arith.constant 0 : index
    %53 = vector.load %arg6[%c0_42, %c0_43, %c0_44] : memref<3x32x32xf32, #tpu.memory_space<vmem>>, vector<1x32x32xf32>
    %54 = vector.shape_cast %53 : vector<1x32x32xf32> to vector<32x32xf32>
    %cst_45 = arith.constant dense<0.000000e+00> : vector<16x32xf32>
    %55 = tpu.matmul %52, %54, %cst_45 {dimension_numbers = #tpu.dot_dimension_numbers<[1], [0], [0], [1], [0, 0, 1, 1], [], []>} : vector<16x32xf32>, vector<32x32xf32>, vector<16x32xf32> -> vector<16x32xf32>
    %c0_46 = arith.constant 0 : index
    %c0_47 = arith.constant 0 : index
    %c0_48 = arith.constant 0 : index
    %56 = vector.load %arg7[%c0_46, %c0_47, %c0_48] : memref<3x1x32xf32, #tpu.memory_space<vmem>>, vector<1x1x32xf32>
    %57 = vector.shape_cast %56 : vector<1x1x32xf32> to vector<1x32xf32>
    %58 = vector.broadcast %57 : vector<1x32xf32> to vector<16x32xf32>
    %59 = arith.addf %55, %58 : vector<16x32xf32>
    %60 = math.tanh %59 : vector<16x32xf32>
    %c1_49 = arith.constant 1 : index
    %c0_50 = arith.constant 0 : index
    %c0_51 = arith.constant 0 : index
    %61 = vector.load %arg6[%c1_49, %c0_50, %c0_51] : memref<3x32x32xf32, #tpu.memory_space<vmem>>, vector<1x32x32xf32>
    %62 = vector.shape_cast %61 : vector<1x32x32xf32> to vector<32x32xf32>
    %cst_52 = arith.constant dense<0.000000e+00> : vector<16x32xf32>
    %63 = tpu.matmul %60, %62, %cst_52 {dimension_numbers = #tpu.dot_dimension_numbers<[1], [0], [0], [1], [0, 0, 1, 1], [], []>} : vector<16x32xf32>, vector<32x32xf32>, vector<16x32xf32> -> vector<16x32xf32>
    %c1_53 = arith.constant 1 : index
    %c0_54 = arith.constant 0 : index
    %c0_55 = arith.constant 0 : index
    %64 = vector.load %arg7[%c1_53, %c0_54, %c0_55] : memref<3x1x32xf32, #tpu.memory_space<vmem>>, vector<1x1x32xf32>
    %65 = vector.shape_cast %64 : vector<1x1x32xf32> to vector<1x32xf32>
    %66 = vector.broadcast %65 : vector<1x32xf32> to vector<16x32xf32>
    %67 = arith.addf %63, %66 : vector<16x32xf32>
    %68 = math.tanh %67 : vector<16x32xf32>
    %c2_56 = arith.constant 2 : index
    %c0_57 = arith.constant 0 : index
    %c0_58 = arith.constant 0 : index
    %69 = vector.load %arg6[%c2_56, %c0_57, %c0_58] : memref<3x32x32xf32, #tpu.memory_space<vmem>>, vector<1x32x32xf32>
    %70 = vector.shape_cast %69 : vector<1x32x32xf32> to vector<32x32xf32>
    %cst_59 = arith.constant dense<0.000000e+00> : vector<16x32xf32>
    %71 = tpu.matmul %68, %70, %cst_59 {dimension_numbers = #tpu.dot_dimension_numbers<[1], [0], [0], [1], [0, 0, 1, 1], [], []>} : vector<16x32xf32>, vector<32x32xf32>, vector<16x32xf32> -> vector<16x32xf32>
    %c2_60 = arith.constant 2 : index
    %c0_61 = arith.constant 0 : index
    %c0_62 = arith.constant 0 : index
    %72 = vector.load %arg7[%c2_60, %c0_61, %c0_62] : memref<3x1x32xf32, #tpu.memory_space<vmem>>, vector<1x1x32xf32>
    %73 = vector.shape_cast %72 : vector<1x1x32xf32> to vector<1x32xf32>
    %74 = vector.broadcast %73 : vector<1x32xf32> to vector<16x32xf32>
    %75 = arith.addf %71, %74 : vector<16x32xf32>
    %76 = math.tanh %75 : vector<16x32xf32>
    %77 = vector.shape_cast %76 : vector<16x32xf32> to vector<2x8x32xf32>
    %78 = vector.shape_cast %51 : vector<2x32xf32> to vector<2x1x32xf32>
    %79 = vector.broadcast %78 : vector<2x1x32xf32> to vector<2x8x32xf32>
    %80 = arith.mulf %77, %79 : vector<2x8x32xf32>
    %81 = vector.shape_cast %80 : vector<2x8x32xf32> to vector<16x32xf32>
    %c0_63 = arith.constant 0 : index
    %c0_64 = arith.constant 0 : index
    %82 = vector.load %arg8[%c0_63, %c0_64] : memref<32x128xf32, #tpu.memory_space<vmem>>, vector<32x128xf32>
    %cst_65 = arith.constant dense<0.000000e+00> : vector<16x128xf32>
    %83 = tpu.matmul %81, %82, %cst_65 {dimension_numbers = #tpu.dot_dimension_numbers<[1], [0], [0], [1], [0, 0, 1, 1], [], []>} : vector<16x32xf32>, vector<32x128xf32>, vector<16x128xf32> -> vector<16x128xf32>
    %c0_66 = arith.constant 0 : index
    %c0_67 = arith.constant 0 : index
    %84 = vector.load %arg9[%c0_66, %c0_67] : memref<1x128xf32, #tpu.memory_space<vmem>>, vector<1x128xf32>
    %85 = vector.broadcast %84 : vector<1x128xf32> to vector<16x128xf32>
    %86 = arith.addf %83, %85 : vector<16x128xf32>
    %c0_68 = arith.constant 0 : index
    %c0_69 = arith.constant 0 : index
    %87 = vector.load %arg10[%c0_68, %c0_69] : memref<16x128xf32, #tpu.memory_space<vmem>>, vector<16x128xf32>
    tpu.vector_store %arg10[%c0_68, %c0_69], %86 {strides = array<i32>} : memref<16x128xf32, #tpu.memory_space<vmem>>, vector<16x128xf32>,
    return
  }
}

</mosaic_0001>

<bundles_post_ra>
// kernel: edeeponet_forward.1
= control target key start
LH: loop header
LB: loop body
LE: loop exit
PB: predicated region body
PF: predicated region fallthrough
CT: control target
= control target key end

     0   :  { %15 = vsyncpa [#allocation3], 0  ;;  %s1779_s0 = inlined_call_operand.vmem [shape: f32[2,96], index: 0, kind: input, shape index: {}]   ;;  %s1780_s1 = inlined_call_operand.vmem [shape: f32[16,32], index: 1, kind: input, shape index: {}]   ;;  %s1781_s2 = inlined_call_operand.hbm [shape: f32[3,96,96], index: 2, kind: input, shape index: {}]   ;;  %s1782_s3 = inlined_call_operand.vmem [shape: f32[3,1,96], index: 3, kind: input, shape index: {}]   ;;  %s1783_s4 = inlined_call_operand.vmem [shape: f32[3,32,32], index: 4, kind: input, shape index: {}]   ;;  %s1784_s5 = inlined_call_operand.vmem [shape: f32[3,1,32], index: 5, kind: input, shape index: {}]   ;;  %s1785_s6 = inlined_call_operand.hbm [shape: f32[3,32,32], index: 6, kind: input, shape index: {}]   ;;  %s1786_s7 = inlined_call_operand.vmem [shape: f32[3,1,32], index: 7, kind: input, shape index: {}]   ;;  %s1787_s8 = inlined_call_operand.hbm [shape: f32[32,128], index: 8, kind: input, shape index: {}]   ;;  %s1788_s9 = inlined_call_operand.vmem [shape: f32[1,128], index: 9, kind: input, shape index: {}]   ;;  %s1789_s10 = inlined_call_operand.vmem [shape: f32[16,128], index: 10, kind: output, shape index: {}]  }
   0x1   :  { %16 = vsyncpa [#allocation5], 0  ;;  %s1530_s13 = smov [#allocation4]   ;;  %s1531_s15 = smov [#allocation2]  }
   0x2   :  { %s44_s14 = sshll.u32 %s1530_s13, 4  ;;  %s26_s16 = sshll.u32 %s1531_s15, 4  ;;  %s45_s14 = int_to_ptr.vmem [resolvable:$true] %s44_s14  ;;  %s1596_s16 = int_to_ptr.vmem [resolvable:$true] %s26_s16 }
   0x3   :  { %s1460_s19 = scalar_lea.hbm %s1785_s6, 1536 }
   0x4   :  { %p1461_p0 = scmp.ne.s32.totalorder %s1785_s6, %s1460_s19  ;;  %p1464_p1 = scmp.lt.u32.totalorder %s1460_s19, %s1785_s6 }
   0x6   :  { %p1466_p2 = pnand %p1464_p1, %p1461_p0 }
   0x8   :  { %1469 = shalt.err (!%p1466_p2)
}
   0x9   :  { %s1470_s24 = scalar_lea.vmem %s45_s14, 1536  ;;  %p1475_p4 = scmp.lt.s32.totalorder %s45_s14, %s45_s14 }
   0xa   :  { %p1471_p3 = scmp.ne.s32.totalorder %s45_s14, %s1470_s24  ;;  %p1476_p5 = scmp.lt.s32.totalorder %s1470_s24, %s1470_s24 }
   0xc   :  { %p1477_p6 = por %p1476_p5, %p1475_p4 }
   0xe   :  { %p1478_p7 = pnand %p1477_p6, %p1471_p3 }
  0x10   :  { %1481 = shalt.err (!%p1478_p7)
}
  0x11   :  { %s1532_s25 = smov 128   ;;  %s1533_s26 = smov 8  }
  0x12   :  { %50 = dma.hbm_to_vmem [thread:$0]  %s1785_s6, 1536, %s45_s14, [#allocation5], %s1532_s25, %s1532_s25, %s1533_s26  }
  0x13   :  { %s1482_s11 = scalar_lea.hbm %s1781_s2, 4608 }
  0x14   :  { %p1483_p8 = scmp.ne.s32.totalorder %s1781_s2, %s1482_s11  ;;  %p1486_p9 = scmp.lt.u32.totalorder %s1482_s11, %s1781_s2 }
  0x16   :  { %p1488_p10 = pnand %p1486_p9, %p1483_p8 }
  0x18   :  { %1491 = shalt.err (!%p1488_p10)
}
  0x19   :  { %s1492_s18 = scalar_lea.vmem %s1596_s16, 4608  ;;  %p1497_p12 = scmp.lt.s32.totalorder %s1596_s16, %s1596_s16 }
  0x1a   :  { %p1493_p11 = scmp.ne.s32.totalorder %s1596_s16, %s1492_s18  ;;  %p1498_p13 = scmp.lt.s32.totalorder %s1492_s18, %s1492_s18 }
  0x1c   :  { %p1499_p0 = por %p1498_p13, %p1497_p12 }
  0x1e   :  { %p1500_p1 = pnand %p1499_p0, %p1493_p11 }
  0x20   :  { %1503 = shalt.err (!%p1500_p1)
}
  0x21   :  { %32 = dma.hbm_to_vmem [thread:$0]  %s1781_s2, 4608, %s1596_s16, [#allocation3], %s1532_s25, %s1532_s25, %s1533_s26  }
  0x22   :  { %s1534_s19 = smov [#allocation6]   ;;  %s1504_s23 = scalar_lea.hbm %s1787_s8, 512 }
  0x23   :  { %s58_s20 = sshll.u32 %s1534_s19, 4  ;;  %p1505_p2 = scmp.ne.s32.totalorder %s1787_s8, %s1504_s23  ;;  %s59_s20 = int_to_ptr.vmem [resolvable:$true] %s58_s20 }
  0x24   :  { %p1508_p3 = scmp.lt.u32.totalorder %s1504_s23, %s1787_s8 }
  0x26   :  { %p1510_p4 = pnand %p1508_p3, %p1505_p2 }
  0x28   :  { %1513 = shalt.err (!%p1510_p4)
}
  0x29   :  { %s1514_s30 = scalar_lea.vmem %s59_s20, 512  ;;  %p1519_p6 = scmp.lt.s32.totalorder %s59_s20, %s59_s20 }
  0x2a   :  { %p1515_p5 = scmp.ne.s32.totalorder %s59_s20, %s1514_s30  ;;  %p1520_p7 = scmp.lt.s32.totalorder %s1514_s30, %s1514_s30 }
  0x2c   :  { %p1521_p8 = por %p1520_p7, %p1519_p6 }
  0x2e   :  { %p1522_p9 = pnand %p1521_p8, %p1515_p5 }
  0x30   :  { %1525 = shalt.err (!%p1522_p9)
}
  0x31   :  { %64 = dma.hbm_to_vmem [thread:$0]  %s1787_s8, 512, %s59_s20, [#allocation5], %s1532_s25, %s1532_s25, %s1533_s26  }
  0x32   :  { %1526 = dma.done.wait [#allocation3], 4608  }
  0x33   :  { %1527 = vsyncadd [#allocation3], 4294962688 }
  0x34   :  { %1528 = dma.done.wait [#allocation5], 2048  }
  0x35   :  { %1529 = vsyncadd [#allocation5], 4294965248  ;;  %v1535_v0 = vmov 0.0|0.0   ;;  %vm1536_vm0 = vmmov 0   ;;  %v1537_v1 = vmov 0.0   ;;  %v77_v2 = vld [vmem:[#allocation2] sm:$0xff] }
  0x36   :  { %1325 = vmatprep.subr.bf16.mxu0 %v1535_v0  ;;  %1191 = vmatprep.mubr.msk.f32.mxu0 %vm1536_vm0, %v1537_v1  ;;  %v78_v3 = vld [vmem:[#allocation2 + $0x8] sm:$0xff]  ;;  %v79_v4 = vld [vmem:[#allocation2 + $0x10] sm:$0xff]  ;;  %v80_v6 = vld [vmem:[#allocation2 + $0x18] sm:$0xff]  ;;  %vm96_vm1 = vcmask 785408   ;;  %s1538_s23 = smov 96   ;;  %s1539_s24 = smov 64  }
  0x37   :  { %1343 = vmatprep.subr.bf16.mxu1 %v1535_v0  ;;  %1218 = vmatprep.mubr.msk.f32.mxu1 %vm1536_vm0, %v1537_v1  ;;  %v1326_v5 = vpack.c.bf16 %v78_v3, %v77_v2  ;;  %v1329_v7 = vpack.c.bf16 %v80_v6, %v79_v4  ;;  %v81_v8 = vld [vmem:[#allocation2 + $0x20] sm:$0xff]  ;;  %v82_v9 = vld [vmem:[#allocation2 + $0x28] sm:$0xff]  ;;  %v174_v13 = vld [vmem:[#allocation2 + $0x70] sm:$0xff]  ;;  %vm380_vm2 = vcmask 261120  }
  0x38   :  { %v172_v10 = vld [vmem:[#allocation2 + $0x60] sm:$0xff]  ;;  %v173_v11 = vld [vmem:[#allocation2 + $0x68] sm:$0xff]  ;;  %v175_v14 = vld [vmem:[#allocation2 + $0x78] sm:$0xff]  ;;  %v1332_v15 = vpack.c.bf16 %v82_v9, %v81_v8 }
  0x39   :  { %1327 = vmatpush3.bf16.msra.mxu0 %v1326_v5  ;;  %v1344_v12 = vpack.c.bf16 %v173_v11, %v172_v10  ;;  %v83_v16 = vld [vmem:[#allocation2 + $0x30] sm:$0xff]  ;;  %v1347_v17 = vpack.c.bf16 %v175_v14, %v174_v13  ;;  %v84_v18 = vld [vmem:[#allocation2 + $0x38] sm:$0xff]  ;;  %v176_v19 = vld [vmem:[#allocation2 + $0x80] sm:$0xff] }
  0x3a   :  { %1328 = vmatprep.subr.bf16.mxu0 %v1535_v0  ;;  %v177_v20 = vld [vmem:[#allocation2 + $0x88] sm:$0xff]  ;;  %v1335_v21 = vpack.c.bf16 %v84_v18, %v83_v16  ;;  %v85_v23 = vld [vmem:[#allocation2 + $0x40] sm:$0xff]  ;;  %v87_v26 = vld [vmem:[#allocation2 + $0x50] sm:$0xff] }
  0x3b   :  { %1345 = vmatpush3.bf16.msra.mxu1 %v1344_v12  ;;  %v1350_v22 = vpack.c.bf16 %v177_v20, %v176_v19  ;;  %v86_v24 = vld [vmem:[#allocation2 + $0x48] sm:$0xff]  ;;  %v88_v27 = vld [vmem:[#allocation2 + $0x58] sm:$0xff]  ;;  %v178_v30 = vld [vmem:[#allocation2 + $0x90] sm:$0xff] }
  0x3c   :  { %1346 = vmatprep.subr.bf16.mxu1 %v1535_v0  ;;  %v1338_v25 = vpack.c.bf16 %v86_v24, %v85_v23  ;;  %v1341_v28 = vpack.c.bf16 %v88_v27, %v87_v26  ;;  %v76_v29 = vld [vmem:[%s1779_s0] sm:$0x3]  ;;  %v180_v33 = vld [vmem:[#allocation2 + $0xa0] sm:$0xff]  ;;  %v181_v34 = vld [vmem:[#allocation2 + $0xa8] sm:$0xff] }
  0x3d   :  { %1330 = vmatpush3.bf16.msra.mxu0 %v1329_v7  ;;  %v179_v31 = vld [vmem:[#allocation2 + $0x98] sm:$0xff]  ;;  %v1356_v35 = vpack.c.bf16 %v181_v34, %v180_v33  ;;  %v182_v36 = vld [vmem:[#allocation2 + $0xb0] sm:$0xff]  ;;  %v267_v39 = vld [vmem:[#allocation2 + $0xc0] sm:$0xff] }
  0x3e   :  { %1331 = vmatprep.subr.bf16.mxu0 %v1535_v0  ;;  %v1353_v32 = vpack.c.bf16 %v179_v31, %v178_v30  ;;  %v183_v37 = vld [vmem:[#allocation2 + $0xb8] sm:$0xff]  ;;  %v268_v40 = vld [vmem:[#allocation2 + $0xc8] sm:$0xff]  ;;  %v269_v41 = vld [vmem:[#allocation2 + $0xd0] sm:$0xff] }
  0x3f   :  { %1348 = vmatpush3.bf16.msra.mxu1 %v1347_v17  ;;  %v1359_v38 = vpack.c.bf16 %v183_v37, %v182_v36  ;;  %v1362_v42 = vpack.c.bf16 %v268_v40, %v267_v39  ;;  %v270_v43 = vld [vmem:[#allocation2 + $0xd8] sm:$0xff]  ;;  %v271_v45 = vld [vmem:[#allocation2 + $0xe0] sm:$0xff]  ;;  %v272_v46 = vld [vmem:[#allocation2 + $0xe8] sm:$0xff] }
  0x40   :  { %1349 = vmatprep.subr.bf16.mxu1 %v1535_v0  ;;  %v1365_v44 = vpack.c.bf16 %v270_v43, %v269_v41  ;;  %v1368_v47 = vpack.c.bf16 %v272_v46, %v271_v45  ;;  %v1051_v48 = vld [vmem:[%s1782_s3] ss:$0 sm:$0xff]  ;;  %v273_v53 = vld [vmem:[#allocation2 + $0xf0] sm:$0xff]  ;;  %v275_v56 = vld [vmem:[#allocation2 + $0x100] sm:$0xff] }
  0x41   :  { %1333 = vmatpush3.bf16.msra.mxu0 %v1332_v15  ;;  %v274_v54 = vld [vmem:[#allocation2 + $0xf8] sm:$0xff]  ;;  %v276_v57 = vld [vmem:[#allocation2 + $0x108] sm:$0xff]  ;;  %v277_v59 = vld [vmem:[#allocation2 + $0x110] sm:$0xff] }
  0x42   :  { %1334 = vmatprep.subr.bf16.mxu0 %v1535_v0  ;;  %v1371_v55 = vpack.c.bf16 %v274_v54, %v273_v53  ;;  %v1374_v58 = vpack.c.bf16 %v276_v57, %v275_v56  ;;  %v278_v60 = vld [vmem:[#allocation2 + $0x118] sm:$0xff]  ;;  %v370_v6 = vld [vmem:[%s1783_s4 + $0x8] sm:$0xff]  ;;  %v371_v8 = vld [vmem:[%s1783_s4 + $0x10] sm:$0xff] }
  0x43   :  { %1351 = vmatpush3.bf16.msra.mxu1 %v1350_v22  ;;  %v1377_v61 = vpack.c.bf16 %v278_v60, %v277_v59  ;;  %v1054_v62 = vld [vmem:[%s1782_s3 + $0x1] ss:$0 sm:$0xff]  ;;  %v372_v9 = vld [vmem:[%s1783_s4 + $0x18] sm:$0xff]  ;;  %v1057_v11 = vld [vmem:[%s1782_s3 + $0x2] ss:$0 sm:$0xff] }
  0x44   :  { %1352 = vmatprep.subr.bf16.mxu1 %v1535_v0  ;;  %v369_v5 = vld [vmem:[%s1783_s4] sm:$0xff]  ;;  %v1383_v10 = vpack.c.bf16 %v372_v9, %v371_v8  ;;  %v1062_v20 = vld [vmem:[%s1783_s4 + $0x28] sm:$0xff]  ;;  %v631_v23 = vld [vmem:[#allocation4 + $0x8] sm:$0xff] }
  0x45   :  { %1336 = vmatpush3.bf16.msra.mxu0 %v1335_v21  ;;  %v1380_v7 = vpack.c.bf16 %v370_v6, %v369_v5  ;;  %v1061_v19 = vld [vmem:[%s1783_s4 + $0x20] sm:$0xff]  ;;  %v630_v21 = vld [vmem:[#allocation4] sm:$0xff]  ;;  %v1063_v24 = vld [vmem:[%s1783_s4 + $0x30] sm:$0xff] }
  0x46   :  { %1337 = vmatprep.subr.bf16.mxu0 %v1535_v0  ;;  %v1386_v22 = vpack.c.bf16 %v1062_v20, %v1061_v19  ;;  %v1397_v26 = vpack.c.bf16 %v631_v23, %v630_v21  ;;  %v628_v31 = vld [vmem:[%s1780_s1] sm:$0xff]  ;;  %v1069_v39 = vld [vmem:[%s1783_s4 + $0x48] sm:$0xff]  ;;  %v1071_v43 = vld [vmem:[%s1783_s4 + $0x58] sm:$0xff]  ;;  %v1540_v19 = vmov 1966171168   ;;  %v920_v21 = vlaneseq }
  0x47   :  { %1354 = vmatpush3.bf16.msra.mxu1 %v1353_v32  ;;  %v629_v32 = vld [vmem:[%s1780_s1 + $0x8] sm:$0xff]  ;;  %v1059_v33 = vld [vmem:[%s1784_s5] ss:$0 sm:$0xff]  ;;  %v726_v45 = vld [vmem:[#allocation4 + $0x28] sm:$0xff]  ;;  %v918_v20 = vunpack.c.l.s4 %v1540_v19 }
  0x48   :  { %1355 = vmatprep.subr.bf16.mxu1 %v1535_v0  ;;  %v821_v60 = vld [vmem:[#allocation4 + $0x40] sm:$0xff]  ;;  %v1079_v6 = vld [vmem:[%s1786_s7 + $0x1] ss:$0 sm:$0xff]  ;;  %v921_v23 = vshrl.u32 %v920_v21, 7 }
  0x49   :  { %1339 = vmatpush3.bf16.msra.mxu0 %v1338_v25  ;;  %v1064_v25 = vld [vmem:[%s1783_s4 + $0x38] sm:$0xff] }
  0x4a   :  { %1340 = vmatprep.subr.bf16.mxu0 %v1535_v0  ;;  %v1389_v27 = vpack.c.bf16 %v1064_v25, %v1063_v24  ;;  %v1073_v24 = vld [vmem:[%s1784_s5 + $0x2] ss:$0 sm:$0xff] }
  0x4b   :  { %1357 = vmatpush3.bf16.msra.mxu1 %v1356_v35 }
  0x4c   :  { %1358 = vmatprep.subr.bf16.mxu1 %v1535_v0 }
  0x4d   :  { %1342 = vmatpush3.bf16.msra.mxu0 %v1341_v28  ;;  %v632_v28 = vld [vmem:[#allocation4 + $0x10] sm:$0xff] }
  0x4e   :  { %1361 = vmatprep.subr.bf16.mxu0 %v1535_v0 }
  0x4f   :  { %1360 = vmatpush3.bf16.msra.mxu1 %v1359_v38  ;;  %v1068_v38 = vld [vmem:[%s1783_s4 + $0x40] sm:$0xff] }
  0x50   :  { %1192 = vmatmul.mubr.msk.f32.vlgmr.msra.gmra.mrb[0].mxu0 %vm96_vm1, %v76_v29  ;;  %1379 = vmatprep.subr.bf16.mxu1 %v1535_v0  ;;  %v633_v29 = vld [vmem:[#allocation4 + $0x18] sm:$0xff]  ;;  %v1392_v41 = vpack.c.bf16 %v1069_v39, %v1068_v38 }
  0x51   :  { %1245 = vmatprep.mubr.msk.f32.mxu0 %vm1536_vm0, %v1537_v1  ;;  %1363 = vmatpush3.bf16.msra.mxu0 %v1362_v42  ;;  %v1401_v30 = vpack.c.bf16 %v633_v29, %v632_v28  ;;  %v1070_v42 = vld [vmem:[%s1783_s4 + $0x50] sm:$0xff] }
  0x52   :  { %1364 = vmatprep.subr.bf16.mxu0 %v1535_v0  ;;  %v1395_v46 = vpack.c.bf16 %v1071_v43, %v1070_v42  ;;  %v1086_v43 = vld [vmem:[%s1788_s9] ss:$0 sm:$0xff] }
  0x55   :  { %1366 = vmatpush3.bf16.msra.mxu0 %v1365_v44  ;;  %v725_v44 = vld [vmem:[#allocation4 + $0x20] sm:$0xff] }
  0x56   :  { %1367 = vmatprep.subr.bf16.mxu0 %v1535_v0 }
  0x59   :  { %1369 = vmatpush3.bf16.msra.mxu0 %v1368_v47  ;;  %v1405_v47 = vpack.c.bf16 %v726_v45, %v725_v44 }
  0x5a   :  { %1370 = vmatprep.subr.bf16.mxu0 %v1535_v0 }
  0x5d   :  { %1372 = vmatpush3.bf16.msra.mxu0 %v1371_v55  ;;  %v727_v55 = vld [vmem:[#allocation4 + $0x30] sm:$0xff] }
  0x5e   :  { %1373 = vmatprep.subr.bf16.mxu0 %v1535_v0 }
  0x61   :  { %1375 = vmatpush3.bf16.msra.mxu0 %v1374_v58 }
  0x62   :  { %1376 = vmatprep.subr.bf16.mxu0 %v1535_v0 }
  0x65   :  { %1378 = vmatpush3.bf16.msra.mxu0 %v1377_v61  ;;  %v822_v61 = vld [vmem:[#allocation4 + $0x48] sm:$0xff] }
  0x66   :  { %1398 = vmatprep.subr.bf16.mxu0 %v1397_v26 }
 0x123   :  { %v166_v49 = vpop.f32.mrb[0].mxu0 }
 0x124   :  { %v167_v50 = vadd.f32 %v1051_v48, %v166_v49  ;;  %v1193_v51 = vpop.f32.mrb[1].mxu0  ;;  %v1075_v48 = vld [vmem:[%s1786_s7] ss:$0 sm:$0xff]  ;;  %v1066_v49 = vld [vmem:[%s1784_s5 + $0x1] ss:$0 sm:$0xff] }
 0x126   :  { %1440 = vtanh.f32 %v167_v50 }
 0x130   :  { %v1441_v52 = vpop.eup %1440 }
 0x131   :  { %1219 = vmatmul.mubr.msk.f32.vlgmr.msra.gmra.mrb[0].mxu1 %vm96_vm1, %v1441_v52 }
 0x132   :  { %1256 = vmatprep.mubr.msk.f32.mxu1 %vm1536_vm0, %v1537_v1  ;;  %1381 = vmatpush3.bf16.msra.mxu1 %v1380_v7 }
 0x133   :  { %1382 = vmatprep.subr.bf16.mxu1 %v1535_v0 }
 0x136   :  { %1384 = vmatpush3.bf16.msra.mxu1 %v1383_v10 }
 0x137   :  { %1385 = vmatprep.subr.bf16.mxu1 %v1535_v0 }
 0x204   :  { %v261_v63 = vpop.f32.mrb[0].mxu1 }
 0x205   :  { %v262_v2 = vadd.f32 %v1054_v62, %v261_v63  ;;  %v1220_v3 = vpop.f32.mrb[1].mxu1  ;;  %v823_v62 = vld [vmem:[#allocation4 + $0x50] sm:$0xff]  ;;  %v1413_v63 = vpack.c.bf16 %v822_v61, %v821_v60 }
 0x207   :  { %1442 = vtanh.f32 %v262_v2  ;;  %v824_v2 = vld [vmem:[#allocation4 + $0x58] sm:$0xff] }
 0x208   :  { %v1417_v3 = vpack.c.bf16 %v824_v2, %v823_v62 }
 0x211   :  { %v1443_v4 = vpop.eup %1442 }
 0x212   :  { %1246 = vmatmul.mubr.msk.f32.vlgmr.msra.gmra.mrb[2].mxu0 %vm96_vm1, %v1443_v4 }
 0x213   :  { %1400 = vmatpush3.bf16.msra.mxu0 %v1397_v26  ;;  %1289 = vmatprep.mubr.msk.f32.mxu0 %vm380_vm2, %v628_v31 }
 0x214   :  { %1402 = vmatprep.subr.bf16.mxu0 %v1401_v30 }
 0x217   :  { %1404 = vmatpush3.bf16.msra.mxu0 %v1401_v30 }
 0x218   :  { %1414 = vmatprep.subr.bf16.mxu0 %v1413_v63 }
 0x21a   :  { %1290 = vmatmul.mubr.msk.f32.vlgmr.msra.gmra.mrb[4].mxu0 %vm380_vm2, %v629_v32 }
 0x21b   :  { %1416 = vmatpush3.bf16.msra.mxu0 %v1413_v63 }
 0x21c   :  { %1418 = vmatprep.subr.bf16.mxu0 %v1417_v3 }
 0x21f   :  { %1420 = vmatpush3.bf16.msra.mxu0 %v1417_v3 }
 0x2e5   :  { %v356_v12 = vpop.f32.mrb[2].mxu0 }
 0x2e6   :  { %v357_v13 = vadd.f32 %v1057_v11, %v356_v12  ;;  %v1247_v14 = vpop.f32.mrb[3].mxu0 }
 0x2e7   :  { %v952_v14 = vld [vmem:[#allocation6 + $0x8] sm:$0xff] }
 0x2e8   :  { %361 = vrot.lane.b32.xlu0 %v357_v13, %s1538_s23 }
 0x2ec   :  { %365 = vrot.lane.b32.xlu0 %v357_v13, %s1539_s24 }
 0x2ed   :  { %v1291_v40 = vpop.f32.mrb[4].mxu0 }
 0x2ee   :  { %v719_v54 = vadd.f32 %v1291_v40, %v1075_v48 }
 0x35a   :  { %v362_v15 = vpop.permute.xlu0 %361 }
 0x35b   :  { %v364_v16 = vmul.f32 %v362_v15, %v357_v13  ;;  %v951_v13 = vld [vmem:[#allocation6] sm:$0xff]  ;;  %v953_v15 = vld [vmem:[#allocation6 + $0x10] sm:$0xff] }
 0x35e   :  { %v366_v17 = vpop.permute.xlu0 %365 }
 0x35f   :  { %v368_v18 = vmul.f32 %v366_v17, %v364_v16  ;;  %v1421_v16 = vpack.c.bf16 %v952_v14, %v951_v13  ;;  %v954_v17 = vld [vmem:[#allocation6 + $0x18] sm:$0xff] }
 0x361   :  { %1257 = vmatmul.mubr.msk.f32.vlgmr.msra.gmra.mrb[2].mxu1 %vm380_vm2, %v368_v18  ;;  %v1425_v18 = vpack.c.bf16 %v954_v17, %v953_v15 }
 0x362   :  { %1267 = vmatprep.mubr.msk.f32.mxu1 %vm1536_vm0, %v1537_v1  ;;  %1387 = vmatpush3.bf16.msra.mxu1 %v1386_v22  ;;  %v919_v22 = vunpack.c.0.s8 %v918_v20 }
 0x363   :  { %1388 = vmatprep.subr.bf16.mxu1 %v1535_v0 }
 0x364   :  { %v922_v26 = vsub.s32 %v919_v22, %v921_v23 }
 0x366   :  { %1390 = vmatpush3.bf16.msra.mxu1 %v1389_v27  ;;  %v1083_v27 = vld [vmem:[%s1786_s7 + $0x2] ss:$0 sm:$0xff] }
 0x367   :  { %1391 = vmatprep.subr.bf16.mxu1 %v1535_v0 }
 0x434   :  { %v450_v34 = vpop.f32.mrb[2].mxu1 }
 0x435   :  { %v451_v35 = vadd.f32 %v1059_v33, %v450_v34  ;;  %v1258_v36 = vpop.f32.mrb[3].mxu1 }
 0x436   :  { %v941_v36 = vsub.s32 0, %v921_v23 }
 0x437   :  { %1444 = vtanh.f32 %v451_v35 }
 0x441   :  { %v1445_v37 = vpop.eup %1444 }
 0x442   :  { %1268 = vmatmul.mubr.msk.f32.vlgmr.msra.gmra.mrb[4].mxu1 %vm380_vm2, %v1445_v37 }
 0x443   :  { %1278 = vmatprep.mubr.msk.f32.mxu1 %vm1536_vm0, %v1537_v1  ;;  %v713_v1 = vpop.f32.mrb[5].mxu0  ;;  %1393 = vmatpush3.bf16.msra.mxu1 %v1392_v41 }
 0x444   :  { %1394 = vmatprep.subr.bf16.mxu1 %v1535_v0  ;;  %v714_v50 = vadd.f32 %v1075_v48, %v713_v1  ;;  %v728_v0 = vld [vmem:[#allocation4 + $0x38] sm:$0xff] }
 0x445   :  { %v1409_v57 = vpack.c.bf16 %v728_v0, %v727_v55 }
 0x446   :  { %1446 = vtanh.f32 %v714_v50 }
 0x447   :  { %1396 = vmatpush3.bf16.msra.mxu1 %v1395_v46 }
 0x448   :  { %1406 = vmatprep.subr.bf16.mxu1 %v1405_v47 }
 0x450   :  { %v1447_v56 = vpop.eup %1446 }
 0x515   :  { %v537_v51 = vpop.f32.mrb[4].mxu1 }
 0x516   :  { %v538_v52 = vadd.f32 %v1066_v49, %v537_v51  ;;  %v1269_v53 = vpop.f32.mrb[5].mxu1 }
 0x518   :  { %1448 = vtanh.f32 %v538_v52 }
 0x519   :  { %1450 = vtanh.f32 %v719_v54 }
 0x522   :  { %v1449_v58 = vpop.eup %1448 }
 0x523   :  { %1279 = vmatmul.mubr.msk.f32.vlgmr.msra.gmra.mrb[6].mxu1 %vm380_vm2, %v1449_v58  ;;  %v1451_v59 = vpop.eup %1450 }
 0x524   :  { %1408 = vmatpush3.bf16.msra.mxu1 %v1405_v47  ;;  %1300 = vmatprep.mubr.msk.f32.mxu1 %vm380_vm2, %v1447_v56 }
 0x525   :  { %1410 = vmatprep.subr.bf16.mxu1 %v1409_v57 }
 0x528   :  { %1412 = vmatpush3.bf16.msra.mxu1 %v1409_v57 }
 0x529   :  { %1422 = vmatprep.subr.bf16.mxu1 %v1421_v16 }
 0x52b   :  { %1301 = vmatmul.mubr.msk.f32.vlgmr.msra.gmra.mrb[8].mxu1 %vm380_vm2, %v1451_v59 }
 0x52c   :  { %1424 = vmatpush3.bf16.msra.mxu1 %v1421_v16 }
 0x52d   :  { %1426 = vmatprep.subr.bf16.mxu1 %v1425_v18 }
 0x530   :  { %1428 = vmatpush3.bf16.msra.mxu1 %v1425_v18 }
 0x5f6   :  { %v624_v4 = vpop.f32.mrb[6].mxu1 }
 0x5f7   :  { %v1280_v5 = vpop.f32.mrb[7].mxu1  ;;  %v625_v25 = vadd.f32 %v1073_v24, %v624_v4 }
 0x5f9   :  { %v923_v28 = vrot.slane %v625_v25, %v922_v26 }
 0x5fb   :  { %v924_v33 = vcombine.high %v923_v28, %v923_v28  ;;  %v931_v35 = vrot.slane %v923_v28, %v922_v26 }
 0x5fd   :  { %v938_v34 = vrot.slane %v924_v33, %v922_v26  ;;  %v942_v39 = vrot.slane %v931_v35, %v941_v36 }
 0x5fe   :  { %v1302_v7 = vpop.f32.mrb[8].mxu1 }
 0x5ff   :  { %v815_v8 = vadd.f32 %v1302_v7, %v1079_v6  ;;  %v809_v9 = vpop.f32.mrb[9].mxu1  ;;  %v946_v37 = vrot.slane %v938_v34, %v941_v36 }
 0x600   :  { %v810_v10 = vadd.f32 %v1079_v6, %v809_v9 }
 0x602   :  { %1452 = vtanh.f32 %v810_v10 }
 0x603   :  { %1454 = vtanh.f32 %v815_v8 }
 0x60c   :  { %v1453_v11 = vpop.eup %1452 }
 0x60d   :  { %v1455_v12 = vpop.eup %1454  ;;  %1311 = vmatprep.mubr.msk.f32.mxu0 %vm380_vm2, %v1453_v11 }
 0x60e   :  { %1312 = vmatmul.mubr.msk.f32.vlgmr.msra.gmra.mrb[6].mxu0 %vm380_vm2, %v1455_v12 }
 0x6e1   :  { %v1313_v29 = vpop.f32.mrb[6].mxu0 }
 0x6e2   :  { %v911_v30 = vadd.f32 %v1313_v29, %v1083_v27  ;;  %v905_v31 = vpop.f32.mrb[7].mxu0 }
 0x6e3   :  { %v906_v32 = vadd.f32 %v1083_v27, %v905_v31 }
 0x6e4   :  { %1456 = vtanh.f32 %v911_v30 }
 0x6e5   :  { %1458 = vtanh.f32 %v906_v32 }
 0x6ee   :  { %v1457_v38 = vpop.eup %1456 }
 0x6ef   :  { %v1459_v40 = vpop.eup %1458  ;;  %v950_v41 = vmul.f32 %v1457_v38, %v946_v37 }
 0x6f0   :  { %v949_v42 = vmul.f32 %v1459_v40, %v942_v39 }
 0x6f2   :  { %1322 = vmatprep.mubr.msk.f32.mxu1 %vm380_vm2, %v949_v42 }
 0x6f3   :  { %1323 = vmatmul.mubr.msk.f32.vlgmr.msra.gmra.mrb[10].mxu1 %vm380_vm2, %v950_v41 }
 0x7c6   :  { %v1324_v44 = vpop.f32.mrb[10].mxu1 }
 0x7c7   :  { %v1040_v1 = vadd.f32 %v1324_v44, %v1086_v43  ;;  %v1034_v45 = vpop.f32.mrb[11].mxu1 }
 0x7c8   :  { %v1035_v46 = vadd.f32 %v1086_v43, %v1034_v45 }
 0x7c9   :  { %1044 = vst [vmem:[%s1789_s10 + $0x8] sm:$0xff] %v1040_v1 }
 0x7ca   :  { %1043 = vst [vmem:[%s1789_s10] sm:$0xff] %v1035_v46 }
 0x7cb   :  { %1049 = vsyncpa [#allocation3], 1 }
 0x7cc   :  { %1050 = vsyncpa [#allocation5], 1 }

</bundles_post_ra>
